<compile_context>
chip_gen: v5e
topology: v5e:2x2
jax: 0.10.0
libtpu: 0.0.40
codegen_flags: <defaults>
</compile_context>

<pallas_src>
import functools

import jax
import jax.numpy as jnp
import numpy as np
from jax.experimental import pallas as pl
from jax.experimental.pallas import tpu as pltpu


def _round_up(x, m):
    return (x + m - 1) // m * m


def _cdiv(a, b):
    return (a + b - 1) // b


def _vmem_capacity_bytes():
    """Physical VMEM of this TPU generation (conservative 64 MiB fallback = v7x)."""
    try:
        info = pltpu.get_tpu_info()
        for attr in ("vmem_capacity_bytes", "vmem_size_bytes", "vmem_bytes"):
            v = getattr(info, attr, None)
            if v:
                return int(v)
    except Exception:
        pass
    return 64 * 1024 * 1024


def _basic_conv_kernel(x_ref, halo_ref, w_ref, bias_ref, o_ref):
    # x_ref:    (1, Ho_t, Wp2, Cin)   bf16   main input rows of this row tile
    # halo_ref: (1, hmax, Wp2, Cin)   bf16   next KH-1 input rows (tile halo)
    # w_ref:    (KH, KW*Cin, Cp)      bf16   BN scale already folded in
    # bias_ref: (1, Cp)               f32    folded BN bias (beta - mean*scale)
    # o_ref:    (1, Ho_t, Wo_p, Cp)
    _, Ho_t, _, Cin = x_ref.shape
    KH, KWC, Cp = w_ref.shape
    KW = KWC // Cin
    Wo_p = o_ref.shape[2]

    x_main = x_ref[0]                                          # (Ho_t, Wp2, Cin)
    if KH > 1:
        x_rows = jnp.concatenate([x_main, halo_ref[0, :KH - 1]], axis=0)
    else:
        x_rows = x_main                                        # (Ht, Wp2, Cin)

    # In-kernel im2col along W: pack the KW taps into the lane dim.  These are
    # VMEM-only copies (ld/st + lane shifts); the KWx amplification never
    # touches HBM.
    if KW > 1:
        xw = jnp.concatenate(
            [x_rows[:, kw:kw + Wo_p, :] for kw in range(KW)], axis=-1)
    else:
        xw = x_rows[:, :Wo_p, :]                               # (Ht, Wo_p, KW*Cin)

    # KH accumulated MXU matmuls (K = KW*Cin, N = Cp), value-level f32
    # accumulation -> single store, no scratch read-modify-write.
    acc = None
    for kh in range(KH):
        patch = xw[kh:kh + Ho_t].reshape(Ho_t * Wo_p, KWC)     # free view (Wo_p % 8 == 0)
        d = jnp.dot(patch, w_ref[kh], preferred_element_type=jnp.float32)
        acc = d if acc is None else acc + d

    # Folded-BatchNorm bias + ReLU epilogue (the scale lives in the weights).
    y = jnp.maximum(acc + bias_ref[...], 0.0)
    o_ref[...] = y.reshape(1, Ho_t, Wo_p, Cp).astype(o_ref.dtype)


def basic_conv(x_nchw, w_oihw, gamma, beta, run_mean, run_var,
               *, padding=0, eps=1e-5):
    """BasicConv forward (conv bias=False, stride=1, dilation=1, groups=1; BN eval; ReLU)."""
    N, Cin, H, W = x_nchw.shape
    Cout, _, KH, KW = w_oihw.shape
    out_dtype = x_nchw.dtype

    Hp, Wp = H + 2 * padding, W + 2 * padding
    Ho, Wo = Hp - KH + 1, Wp - KW + 1

    # ---- tile geometry ------------------------------------------------------
    Wo_p = _round_up(Wo, 8)                 # sublane-aligned slices + M dim
    Wp2 = Wo_p + KW - 1                     # input cols needed per row
    lane = 256 if Cout > 128 else 128       # 256-wide MXU passes on v6e/v7x
    Cp = _round_up(Cout, lane)              # lane-dense output stores
    KWC = KW * Cin
    hmax = max(KH - 1, 1)
    out_bytes = jnp.dtype(out_dtype).itemsize

    # Size the output-row tile from physical VMEM (~60% resident target),
    # accounting for double-buffered x/out tiles, weights and in-kernel temps.
    vmem_phys = _vmem_capacity_bytes()
    budget = int(vmem_phys * 0.6)
    per_row = (2 * Wp2 * Cin * 2            # x main tile (bf16, 2 buffers)
               + 2 * Wo_p * Cp * out_bytes  # out tile (2 buffers)
               + 2 * Wo_p * KWC * 2         # xw pack + per-tap patch temps (bf16)
               + Wo_p * Cp * 4)             # f32 accumulator value
    fixed = (2 * KH * KWC * Cp * 2          # weights (2 buffers)
             + 2 * Cp * 4                   # bias
             + 2 * hmax * Wp2 * Cin * 2     # halo tile (2 buffers)
             + (KH - 1) * Wo_p * KWC * 2    # halo rows of the xw temp
             + (2 << 20))                   # headroom / misc
    rows_fit = max((budget - fixed) // per_row, 1)
    Ho_t = int(min(Ho, rows_fit, 1024))
    R = _cdiv(Ho, Ho_t)
    Ho_t = _cdiv(Ho, R)                     # balance tiles -> minimal wasted rows
    if N == 1 and R == 1 and Ho >= 2:       # keep >=2 grid steps for v7x's 2 TCs
        R, Ho_t = 2, _cdiv(Ho, 2)
    Hm = R * Ho_t                           # main input rows (>= Ho)
    Htot = Hm + KH - 1                      # incl. last tile's halo

    # ---- layout plumbing: ONE NHWC bf16 copy, no im2col in HBM --------------
    x_nhwc = jnp.transpose(x_nchw, (0, 2, 3, 1))
    x_pad = jnp.pad(
        x_nhwc,
        ((0, 0), (padding, Htot - H - padding), (padding, Wp2 - W - padding), (0, 0)),
    ).astype(jnp.bfloat16)                                     # (N, Htot, Wp2, Cin)
    x_main = x_pad[:, :Hm]                                     # (N, Hm, Wp2, Cin)
    if KH > 1:
        # Tiny halo side input: only KH-1 duplicated rows per row tile.
        x_halo = jnp.stack(
            [x_pad[:, (r + 1) * Ho_t:(r + 1) * Ho_t + hmax] for r in range(R)],
            axis=1).reshape(N * R, hmax, Wp2, Cin)
    else:
        x_halo = jnp.zeros((N * R, hmax, Wp2, Cin), jnp.bfloat16)

    # Weights: OIHW -> (KH, KW*Cin, Cout); fold BN scale in f32, pad Cout, bf16.
    scale = gamma / jnp.sqrt(run_var + eps)
    bias = beta - run_mean * scale
    w_k = jnp.transpose(w_oihw, (2, 3, 1, 0)).reshape(KH, KWC, Cout)
    w_k = jnp.pad(w_k * scale[None, None, :],
                  ((0, 0), (0, 0), (0, Cp - Cout))).astype(jnp.bfloat16)
    bias_p = jnp.pad(bias, (0, Cp - Cout)).reshape(1, Cp).astype(jnp.float32)

    # ---- Pallas kernel -------------------------------------------------------
    out = pl.pallas_call(
        _basic_conv_kernel,
        out_shape=jax.ShapeDtypeStruct((N, Hm, Wo_p, Cp), out_dtype),
        grid_spec=pltpu.PrefetchScalarGridSpec(
            num_scalar_prefetch=0,
            grid=(N, R),
            in_specs=[
                pl.BlockSpec((1, Ho_t, Wp2, Cin), lambda n, r: (n, r, 0, 0)),
                pl.BlockSpec((1, hmax, Wp2, Cin), lambda n, r: (n * R + r, 0, 0, 0)),
                pl.BlockSpec((KH, KWC, Cp), lambda n, r: (0, 0, 0)),
                pl.BlockSpec((1, Cp), lambda n, r: (0, 0)),
            ],
            out_specs=pl.BlockSpec((1, Ho_t, Wo_p, Cp), lambda n, r: (n, r, 0, 0)),
        ),
        compiler_params=pltpu.CompilerParams(
            dimension_semantics=("parallel", "parallel"),
            vmem_limit_bytes=int(vmem_phys * 3 // 4),
        ),
    )(x_main, x_halo, w_k, bias_p)

    # Drop row / col / channel padding, back to NCHW.
    out = out[:, :Ho, :Wo, :Cout]
    return jnp.transpose(out, (0, 3, 1, 2))


def _reference(x_nchw, w_oihw, gamma, beta, run_mean, run_var, *, padding, eps=1e-5):
    y = jax.lax.conv_general_dilated(
        x_nchw, w_oihw,
        window_strides=(1, 1),
        padding=((padding, padding), (padding, padding)),
        dimension_numbers=("NCHW", "OIHW", "NCHW"),
    )
    scale = gamma / jnp.sqrt(run_var + eps)
    y = y * scale[None, :, None, None] + (beta - run_mean * scale)[None, :, None, None]
    return jnp.maximum(y, 0.0)


if __name__ == "__main__":
    # BasicConv(in_planes=4, out_planes=8, kernel_size=3, padding=1)
    N, Cin, H, W = 2, 4, 16, 16
    Cout, K, PAD = 8, 3, 1

    key = jax.random.PRNGKey(0)
    kx, kw, kg, kb, km, kv = jax.random.split(key, 6)

    x = jax.random.normal(kx, (N, Cin, H, W), dtype=jnp.float32)
    w = jax.random.normal(kw, (Cout, Cin, K, K), dtype=jnp.float32) * 0.1
    gamma = 1.0 + 0.1 * jax.random.normal(kg, (Cout,), dtype=jnp.float32)
    beta = 0.1 * jax.random.normal(kb, (Cout,), dtype=jnp.float32)
    run_mean = 0.05 * jax.random.normal(km, (Cout,), dtype=jnp.float32)
    run_var = 1.0 + 0.1 * jax.random.uniform(kv, (Cout,), dtype=jnp.float32)

    fn = jax.jit(functools.partial(basic_conv, padding=PAD))
    out = jax.block_until_ready(fn(x, w, gamma, beta, run_mean, run_var))

    ref = _reference(x, w, gamma, beta, run_mean, run_var, padding=PAD)
    # bf16 MXU operands (f32 accumulation) vs the f32 reference -> loose tolerance.
    np.testing.assert_allclose(np.asarray(out), np.asarray(ref), rtol=2e-2, atol=2e-2)

    print("KERNEL_OK")
</pallas_src>

<mosaic_0001>
module attributes {stable_mosaic.version = 11 : i64} {
  func.func @_basic_conv_kernel(%arg0: i32, %arg1: i32, %arg2: memref<1x16x18x4xbf16, #tpu.memory_space<vmem>>, %arg3: memref<1x2x18x4xbf16, #tpu.memory_space<vmem>>, %arg4: memref<3x12x128xbf16, #tpu.memory_space<vmem>>, %arg5: memref<1x128xf32, #tpu.memory_space<vmem>>, %arg6: memref<1x16x16x128xf32, #tpu.memory_space<vmem>>) attributes {dimension_semantics = [#tpu.dimension_semantics<parallel>, #tpu.dimension_semantics<parallel>], iteration_bounds = array<i64: 2, 1>, scalar_prefetch = 0 : i64, scratch_operands = 0 : i64, tpu.core_type = #tpu.core_type<tc>, window_params = [{transform_indices = @transform_0, window_bounds = array<i64: 1, 16, 18, 4>}, {transform_indices = @transform_1, window_bounds = array<i64: 1, 2, 18, 4>}, {pipeline_mode = #tpu.pipeline_mode<synchronous>, transform_indices = @transform_2, window_bounds = array<i64: 3, 12, 128>}, {pipeline_mode = #tpu.pipeline_mode<synchronous>, transform_indices = @transform_3, window_bounds = array<i64: 1, 128>}, {transform_indices = @transform_4, window_bounds = array<i64: 1, 16, 16, 128>}]} {
    %c0 = arith.constant 0 : index
    %c0_0 = arith.constant 0 : index
    %c0_1 = arith.constant 0 : index
    %c0_2 = arith.constant 0 : index
    %0 = vector.load %arg2[%c0, %c0_0, %c0_1, %c0_2] : memref<1x16x18x4xbf16, #tpu.memory_space<vmem>>, vector<1x16x18x4xbf16>
    %1 = vector.shape_cast %0 : vector<1x16x18x4xbf16> to vector<16x18x4xbf16>
    %c0_3 = arith.constant 0 : index
    %c0_4 = arith.constant 0 : index
    %c0_5 = arith.constant 0 : index
    %c0_6 = arith.constant 0 : index
    %2 = vector.load %arg3[%c0_3, %c0_4, %c0_5, %c0_6] : memref<1x2x18x4xbf16, #tpu.memory_space<vmem>>, vector<1x2x18x4xbf16>
    %3 = vector.shape_cast %2 : vector<1x2x18x4xbf16> to vector<2x18x4xbf16>
    %4 = tpu.concatenate %1, %3 in 0 : vector<16x18x4xbf16>, vector<2x18x4xbf16> -> vector<18x18x4xbf16>
    %5 = vector.extract_strided_slice %4 {offsets = [0, 0, 0], sizes = [18, 16, 4], strides = [1, 1, 1]} : vector<18x18x4xbf16> to vector<18x16x4xbf16>
    %6 = vector.extract_strided_slice %4 {offsets = [0, 1, 0], sizes = [18, 16, 4], strides = [1, 1, 1]} : vector<18x18x4xbf16> to vector<18x16x4xbf16>
    %7 = vector.extract_strided_slice %4 {offsets = [0, 2, 0], sizes = [18, 16, 4], strides = [1, 1, 1]} : vector<18x18x4xbf16> to vector<18x16x4xbf16>
    %8 = tpu.concatenate %5, %6, %7 in 2 : vector<18x16x4xbf16>, vector<18x16x4xbf16>, vector<18x16x4xbf16> -> vector<18x16x12xbf16>
    %9 = vector.extract_strided_slice %8 {offsets = [0, 0, 0], sizes = [16, 16, 12], strides = [1, 1, 1]} : vector<18x16x12xbf16> to vector<16x16x12xbf16>
    %10 = vector.shape_cast %9 : vector<16x16x12xbf16> to vector<256x12xbf16>
    %c0_7 = arith.constant 0 : index
    %c0_8 = arith.constant 0 : index
    %c0_9 = arith.constant 0 : index
    %11 = vector.load %arg4[%c0_7, %c0_8, %c0_9] : memref<3x12x128xbf16, #tpu.memory_space<vmem>>, vector<1x12x128xbf16>
    %12 = vector.shape_cast %11 : vector<1x12x128xbf16> to vector<12x128xbf16>
    %cst = arith.constant dense<0.000000e+00> : vector<256x128xf32>
    %13 = tpu.matmul %10, %12, %cst {dimension_numbers = #tpu.dot_dimension_numbers<[1], [0], [0], [1], [0, 0, 1, 1], [], []>} : vector<256x12xbf16>, vector<12x128xbf16>, vector<256x128xf32> -> vector<256x128xf32>
    %14 = vector.extract_strided_slice %8 {offsets = [1, 0, 0], sizes = [16, 16, 12], strides = [1, 1, 1]} : vector<18x16x12xbf16> to vector<16x16x12xbf16>
    %15 = vector.shape_cast %14 : vector<16x16x12xbf16> to vector<256x12xbf16>
    %c1 = arith.constant 1 : index
    %c0_10 = arith.constant 0 : index
    %c0_11 = arith.constant 0 : index
    %16 = vector.load %arg4[%c1, %c0_10, %c0_11] : memref<3x12x128xbf16, #tpu.memory_space<vmem>>, vector<1x12x128xbf16>
    %17 = vector.shape_cast %16 : vector<1x12x128xbf16> to vector<12x128xbf16>
    %cst_12 = arith.constant dense<0.000000e+00> : vector<256x128xf32>
    %18 = tpu.matmul %15, %17, %cst_12 {dimension_numbers = #tpu.dot_dimension_numbers<[1], [0], [0], [1], [0, 0, 1, 1], [], []>} : vector<256x12xbf16>, vector<12x128xbf16>, vector<256x128xf32> -> vector<256x128xf32>
    %19 = arith.addf %13, %18 : vector<256x128xf32>
    %20 = vector.extract_strided_slice %8 {offsets = [2, 0, 0], sizes = [16, 16, 12], strides = [1, 1, 1]} : vector<18x16x12xbf16> to vector<16x16x12xbf16>
    %21 = vector.shape_cast %20 : vector<16x16x12xbf16> to vector<256x12xbf16>
    %c2 = arith.constant 2 : index
    %c0_13 = arith.constant 0 : index
    %c0_14 = arith.constant 0 : index
    %22 = vector.load %arg4[%c2, %c0_13, %c0_14] : memref<3x12x128xbf16, #tpu.memory_space<vmem>>, vector<1x12x128xbf16>
    %23 = vector.shape_cast %22 : vector<1x12x128xbf16> to vector<12x128xbf16>
    %cst_15 = arith.constant dense<0.000000e+00> : vector<256x128xf32>
    %24 = tpu.matmul %21, %23, %cst_15 {dimension_numbers = #tpu.dot_dimension_numbers<[1], [0], [0], [1], [0, 0, 1, 1], [], []>} : vector<256x12xbf16>, vector<12x128xbf16>, vector<256x128xf32> -> vector<256x128xf32>
    %25 = arith.addf %19, %24 : vector<256x128xf32>
    %c0_16 = arith.constant 0 : index
    %c0_17 = arith.constant 0 : index
    %26 = vector.load %arg5[%c0_16, %c0_17] : memref<1x128xf32, #tpu.memory_space<vmem>>, vector<1x128xf32>
    %27 = vector.broadcast %26 : vector<1x128xf32> to vector<256x128xf32>
    %28 = arith.addf %25, %27 : vector<256x128xf32>
    %cst_18 = arith.constant 0.000000e+00 : f32
    %29 = vector.broadcast %cst_18 : f32 to vector<256x128xf32>
    %30 = arith.maximumf %28, %29 : vector<256x128xf32>
    %31 = vector.shape_cast %30 : vector<256x128xf32> to vector<1x16x16x128xf32>
    %c0_19 = arith.constant 0 : index
    %c0_20 = arith.constant 0 : index
    %c0_21 = arith.constant 0 : index
    %c0_22 = arith.constant 0 : index
    %32 = vector.load %arg6[%c0_19, %c0_20, %c0_21, %c0_22] : memref<1x16x16x128xf32, #tpu.memory_space<vmem>>, vector<1x16x16x128xf32>
    tpu.vector_store %arg6[%c0_19, %c0_20, %c0_21, %c0_22], %31 {strides = array<i32>} : memref<1x16x16x128xf32, #tpu.memory_space<vmem>>, vector<1x16x16x128xf32>,
    return
  }
  func.func @transform_0(%arg0: i32, %arg1: i32) -> (i32, i32, i32, i32) {
    %c0_i32 = arith.constant 0 : i32
    %c0_i32_0 = arith.constant 0 : i32
    %c0_i32_1 = arith.constant 0 : i32
    return %arg0, %arg1, %c0_i32, %c0_i32_0 : i32, i32, i32, i32
  }
  func.func @transform_1(%arg0: i32, %arg1: i32) -> (i32, i32, i32, i32) {
    %c1_i32 = arith.constant 1 : i32
    %0 = arith.muli %arg0, %c1_i32 : i32
    %1 = arith.addi %0, %arg1 : i32
    %c0_i32 = arith.constant 0 : i32
    %c0_i32_0 = arith.constant 0 : i32
    %c0_i32_1 = arith.constant 0 : i32
    %c0_i32_2 = arith.constant 0 : i32
    return %1, %c0_i32, %c0_i32_0, %c0_i32_1 : i32, i32, i32, i32
  }
  func.func @transform_2(%arg0: i32, %arg1: i32) -> (i32, i32, i32) {
    %c0_i32 = arith.constant 0 : i32
    %c0_i32_0 = arith.constant 0 : i32
    %c0_i32_1 = arith.constant 0 : i32
    %c0_i32_2 = arith.constant 0 : i32
    return %c0_i32, %c0_i32_0, %c0_i32_1 : i32, i32, i32
  }
  func.func @transform_3(%arg0: i32, %arg1: i32) -> (i32, i32) {
    %c0_i32 = arith.constant 0 : i32
    %c0_i32_0 = arith.constant 0 : i32
    %c0_i32_1 = arith.constant 0 : i32
    return %c0_i32, %c0_i32_0 : i32, i32
  }
  func.func @transform_4(%arg0: i32, %arg1: i32) -> (i32, i32, i32, i32) {
    %c0_i32 = arith.constant 0 : i32
    %c0_i32_0 = arith.constant 0 : i32
    %c0_i32_1 = arith.constant 0 : i32
    return %arg0, %arg1, %c0_i32, %c0_i32_0 : i32, i32, i32, i32
  }
}

</mosaic_0001>

<bundles_post_ra>
// kernel: basic_conv.1
= control target key start
LH: loop header
LB: loop body
LE: loop exit
PB: predicated region body
PF: predicated region fallthrough
CT: control target
= control target key end

     0   :  { %s1715_s15 = smov 0   ;;  %s1717_s16 = smov 0   ;;  %s2242_s0 = inlined_call_operand.vmem [shape: bf16[2,16,18,4], index: 0, kind: input, shape index: {}]   ;;  %s2243_s1 = inlined_call_operand.vmem [shape: bf16[2,2,18,4], index: 1, kind: input, shape index: {}]   ;;  %s2244_s2 = inlined_call_operand.vmem [shape: bf16[3,12,128], index: 2, kind: input, shape index: {}]   ;;  %s2245_s3 = inlined_call_operand.vmem [shape: f32[1,128], index: 3, kind: input, shape index: {}]   ;;  %s2246_s4 = inlined_call_operand.vmem [shape: f32[2,16,16,128], index: 4, kind: output, shape index: {}]  }
   0x1   :  { %s1719_s17 = smov 0  }
   0x2 LB: > { %s26_s18 = sadd.s32 1, %s1682_s16  ;;  %p1467_p0 = scmp.ge.s32.totalorder %s1686_s17, 1  ;;  %s1686_s17 = sphi %s1719_s17, %s14_s17   ;;  %s1682_s16 = sphi %s1717_s16, %s2248_s16   ;;  %s1678_s15 = sphi %s1715_s15, %s2247_s15  }
   0x3   : > { %p28_p1 = scmp.ge.s32.totalorder %s26_s18, 2  ;;  %p198_p2 = scmp.lt.s32.totalorder %s1686_s17, 3 }
   0x5   : > { %s2250_s18 = smov (%p28_p1, %s26_s18), 0  ;;  %p199_p3 = pnand %p1467_p0, %p198_p2 }
   0x6   : > { %p241_p4 = scmp.lt.s32.totalorder (!%p199_p3), %s1678_s15, 1  ;;  %s1688_s23 = smov (!%p199_p3), 8  }
   0x7   : > { %202 = sbr.rel (%p199_p3) target bundleno = 477 (0x1dd), region = 36  ;;  %s1689_s24 = smov (!%p199_p3), 4  }
   0xc   : > { %s2252_s15 = smov (!%p241_p4, %s1678_s15), 1  ;;  %vm721_vm0 = vcmask 1046528   ;;  %vm468_vm1 = vsmask.f32 7424  ;;  %vm929_vm2 = vcmask 1045504   ;;  %vm812_vm3 = vcmask 31744  }
   0xd   : > { %s1635_s19 = smul.u32 192, %s2252_s15  ;;  %vm849_vm4 = vcmask 64512   ;;  %vm896_vm5 = vcmask 97280   ;;  %s1610_s21 = sshll.u32 %s2252_s15, 8 }
   0xe   : > { %s1636_s25 = smul.u32 24, %s2252_s15 }
   0xf   : > { %s1739_s22 = scalar_lea.vmem %s2242_s0, %s1635_s19 }
  0x10   : > { %v1742_v0 = vld [vmem:[%s1739_s22 + $0x18] sm:$0xff]  ;;  %v278_v1 = vld [vmem:[%s1739_s22 + $0x20] sm:$0x1]  ;;  %v311_v4 = vld [vmem:[%s1739_s22 + $0xa4] sm:$0x1]  ;;  %s1828_s28 = scalar_lea.vmem %s2243_s1, %s1636_s25 }
  0x11   : > { %v1746_v2 = vld [vmem:[%s1739_s22 + $0x9c] sm:$0xff]  ;;  %v434_v3 = vunpack.c.l.b16 %v278_v1  ;;  %v494_v5 = vshrl.u32 %v1742_v0, 16  ;;  %v496_v6 = vshll.u32 %v1742_v0, 16  ;;  %v445_v7 = vunpack.c.l.b16 %v311_v4  ;;  %v272_v11 = vld [vmem:[%s1739_s22 + $0x8] sm:$0x1]  ;;  %v1770_v38 = vld [vmem:[%s1739_s22 + $0xc] sm:$0xff] }
  0x12   : > { %v728_v9 = vrot.slane %v1742_v0, 1  ;;  %v628_v10 = vshll.u32 %v1746_v2, 16  ;;  %v626_v17 = vshrl.u32 %v1746_v2, 16  ;;  %v275_v18 = vld [vmem:[%s1739_s22 + $0x14] sm:$0x1]  ;;  %v432_v19 = vunpack.c.l.b16 %v272_v11  ;;  %v1762_v28 = vld [vmem:[%s1739_s22] sm:$0xff] }
  0x13   : > { %v452_v8 = vpack.c.b16 %v434_v3, %v434_v3  ;;  %v498_v12 = vrot.slane %v496_v6, 1  ;;  %v463_v13 = vpack.c.b16 %v445_v7, %v445_v7  ;;  %v761_v25 = vrot.slane %v1746_v2, 1  ;;  %v281_v32 = vld [vmem:[%s1739_s22 + $0x2c] sm:$0x1]  ;;  %v314_v33 = vld [vmem:[%s1739_s22 + $0xb0] sm:$0x1] }
  0x14   : > { %v630_v22 = vrot.slane %v628_v10, 1  ;;  %v433_v27 = vunpack.c.l.b16 %v275_v18  ;;  %v450_v29 = vpack.c.b16 %v432_v19, %v432_v19  ;;  %v470_v34 = vshrl.u32 %v1762_v28, 16  ;;  %v1774_v44 = vld [vmem:[%s1739_s22 + $0xa8] sm:$0xff]  ;;  %v317_v57 = vld [vmem:[%s1739_s22 + $0xbc] sm:$0x1]  ;;  %v1795_v4 = vld [vmem:[%s1739_s22 + $0xb4] sm:$0xff] }
  0x15   : > { %v729_v14 = vrot.slane %v452_v8, 1  ;;  %v501_v15 = vshll.u32 %v452_v8, 16  ;;  %v499_v16 = vor.u32 %v498_v12, %v494_v5  ;;  %v633_v23 = vshll.u32 %v463_v13, 16  ;;  %v1783_v54 = vld [vmem:[%s1739_s22 + $0x24] sm:$0xff]  ;;  %v284_v61 = vld [vmem:[%s1739_s22 + $0x38] sm:$0x1] }
  0x16   : > { %v762_v26 = vrot.slane %v463_v13, 1  ;;  %v631_v30 = vor.u32 %v630_v22, %v626_v17  ;;  %v472_v35 = vshll.u32 %v1762_v28, 16  ;;  %v477_v36 = vshll.u32 %v450_v29, 16  ;;  %v1802_v12 = vld [vmem:[%s1739_s22 + $0x30] sm:$0xff] }
  0x17   : > { %v730_v20 = vsel %vm721_vm0, %v728_v9, %v729_v14  ;;  %v503_v21 = vrot.slane %v501_v15, 1  ;;  %v635_v31 = vrot.slane %v633_v23, 1  ;;  %v451_v39 = vpack.c.b16 %v433_v27, %v433_v27 }
  0x18   : > { %780 = vrot.lane.b32.xlu1 %v730_v20, %s1688_s23  ;;  %v763_v37 = vsel %vm721_vm0, %v761_v25, %v762_v26  ;;  %v474_v40 = vrot.slane %v472_v35, 1  ;;  %v479_v41 = vrot.slane %v477_v36, 1  ;;  %v435_v43 = vunpack.c.l.b16 %v281_v32  ;;  %v287_v20 = vld [vmem:[%s1739_s22 + $0x44] sm:$0x1]  ;;  %v1815_v32 = vld [vmem:[%s1739_s22 + $0x3c] sm:$0xff] }
  0x19   : > { %v504_v24 = vsel %vm468_vm1, %v499_v16, %v503_v21  ;;  %v636_v42 = vsel %vm468_vm1, %v631_v30, %v635_v31  ;;  %v446_v45 = vunpack.c.l.b16 %v314_v33  ;;  %v482_v47 = vshrl.u32 %v1770_v38, 16 }
  0x1a   : > { %689 = vrot.lane.b32.xlu0 %v504_v24, %s1689_s24  ;;  %v475_v46 = vor.u32 %v474_v40, %v470_v34  ;;  %v484_v48 = vshll.u32 %v1770_v38, 16  ;;  %v725_v49 = vrot.slane %v1770_v38, 1  ;;  %v726_v50 = vrot.slane %v451_v39, 1 }
  0x1b   : > { %v489_v51 = vshll.u32 %v451_v39, 16  ;;  %v722_v52 = vrot.slane %v1762_v28, 1  ;;  %v723_v53 = vrot.slane %v450_v29, 1  ;;  %v453_v58 = vpack.c.b16 %v435_v43, %v435_v43 }
  0x1c   : > { %v480_v55 = vsel %vm468_vm1, %v475_v46, %v479_v41  ;;  %v486_v56 = vrot.slane %v484_v48, 1  ;;  %v1787_v59 = vpack.c.b16 %v446_v45, %v446_v45  ;;  %v640_v60 = vshll.u32 %v1774_v44, 16 }
  0x1d   : > { %685 = vrot.lane.b32.xlu2 %v480_v55, %s1689_s24  ;;  %v491_v63 = vrot.slane %v489_v51, 1  ;;  %v508_v1 = vshll.u32 %v1783_v54, 16  ;;  %v727_v3 = vsel %vm721_vm0, %v725_v49, %v726_v50  ;;  %v447_v5 = vunpack.c.l.b16 %v317_v57 }
  0x1e   : > { %v487_v62 = vor.u32 %v486_v56, %v482_v47  ;;  %v724_v6 = vsel %vm721_vm0, %v722_v52, %v723_v53  ;;  %v731_v7 = vrot.slane %v1783_v54, 1  ;;  %v638_v8 = vshrl.u32 %v1774_v44, 16  ;;  %v320_v53 = vld [vmem:[%s1828_s28 + $0x8] sm:$0x1] }
  0x1f   : > { %v732_v9 = vrot.slane %v453_v58, 1  ;;  %v642_v10 = vrot.slane %v640_v60, 1  ;;  %v645_v11 = vshll.u32 %v1787_v59, 16  ;;  %v436_v13 = vunpack.c.l.b16 %v284_v61 }
  0x20   : > { %802 = vrot.lane.b32.xlu1 %v763_v37, %s1688_s23  ;;  %v492_v14 = vsel %vm468_vm1, %v487_v62, %v491_v63  ;;  %v506_v15 = vshrl.u32 %v1783_v54, 16  ;;  %v510_v16 = vrot.slane %v508_v1, 1  ;;  %v513_v17 = vshll.u32 %v453_v58, 16 }
  0x21   : > { %v465_v18 = vpack.c.b16 %v447_v5, %v447_v5  ;;  %v652_v19 = vshll.u32 %v1795_v4, 16  ;;  %v643_v21 = vor.u32 %v642_v10, %v638_v8  ;;  %v647_v22 = vrot.slane %v645_v11, 1  ;;  %v290_v8 = vld [vmem:[%s1739_s22 + $0x50] sm:$0x1] }
  0x22   : > { %711 = vrot.lane.b32.xlu0 %v636_v42, %s1689_s24  ;;  %v454_v23 = vpack.c.b16 %v436_v13, %v436_v13  ;;  %v520_v24 = vshll.u32 %v1802_v12, 16  ;;  %v733_v25 = vsel %vm721_vm0, %v731_v7, %v732_v9  ;;  %v511_v26 = vor.u32 %v510_v16, %v506_v15  ;;  %v1851_v10 = vld [vmem:[%s1739_s22 + $0x90] sm:$0xff] }
  0x23   : > { %v515_v27 = vrot.slane %v513_v17, 1  ;;  %v650_v29 = vshrl.u32 %v1795_v4, 16  ;;  %v654_v30 = vrot.slane %v652_v19, 1  ;;  %v657_v31 = vshll.u32 %v465_v18, 16 }
  0x24   : > { %v437_v33 = vunpack.c.l.b16 %v287_v20  ;;  %v648_v34 = vsel %vm468_vm1, %v643_v21, %v647_v22  ;;  %v518_v35 = vshrl.u32 %v1802_v12, 16  ;;  %v522_v36 = vrot.slane %v520_v24, 1  ;;  %v1860_v22 = vld [vmem:[%s1739_s22 + $0x48] sm:$0xff] }
  0x25   : > { %687 = vrot.lane.b32.xlu2 %v492_v14, %s1689_s24  ;;  %v525_v37 = vshll.u32 %v454_v23, 16  ;;  %v516_v39 = vsel %vm468_vm1, %v511_v26, %v515_v27  ;;  %v655_v40 = vor.u32 %v654_v30, %v650_v29  ;;  %v659_v41 = vrot.slane %v657_v31, 1  ;;  %v293_v27 = vld [vmem:[%s1739_s22 + $0x5c] sm:$0x1] }
  0x26   : > { %v455_v42 = vpack.c.b16 %v437_v33, %v437_v33  ;;  %v532_v43 = vshll.u32 %v1815_v32, 16  ;;  %v523_v45 = vor.u32 %v522_v36, %v518_v35  ;;  %v764_v47 = vrot.slane %v1774_v44, 1 }
  0x27   : > { %v527_v46 = vrot.slane %v525_v37, 1  ;;  %v765_v48 = vrot.slane %v1787_v59, 1  ;;  %v660_v49 = vsel %vm468_vm1, %v655_v40, %v659_v41  ;;  %v530_v50 = vshrl.u32 %v1815_v32, 16  ;;  %v1840_v59 = vld [vmem:[%s1828_s28] sm:$0xff]  ;;  %v1870_v37 = vld [vmem:[%s1739_s22 + $0x54] sm:$0xff] }
  0x28   : > { %778 = vrot.lane.b32.xlu1 %v727_v3, %s1688_s23  ;;  %v534_v51 = vrot.slane %v532_v43, 1  ;;  %v537_v52 = vshll.u32 %v455_v42, 16  ;;  %v448_v60 = vunpack.c.l.b16 %v320_v53  ;;  %v767_v61 = vrot.slane %v1795_v4, 1  ;;  %v308_v3 = vld [vmem:[%s1739_s22 + $0x98] sm:$0x1] }
  0x29   : > { %v528_v55 = vsel %vm468_vm1, %v523_v45, %v527_v46  ;;  %v766_v56 = vsel %vm721_vm0, %v764_v47, %v765_v48  ;;  %v768_v62 = vrot.slane %v465_v18, 1  ;;  %v734_v63 = vrot.slane %v1802_v12, 1 }
  0x2a   : > { %776 = vrot.lane.b32.xlu0 %v724_v6, %s1688_s23  ;;  %v535_v57 = vor.u32 %v534_v51, %v530_v50  ;;  %v539_v58 = vrot.slane %v537_v52, 1  ;;  %v735_v1 = vrot.slane %v454_v23, 1  ;;  %v664_v5 = vshll.u32 %v1840_v59, 16 }
  0x2b   : > { %v466_v7 = vpack.c.b16 %v448_v60, %v448_v60  ;;  %v769_v9 = vsel %vm721_vm0, %v767_v61, %v768_v62  ;;  %v444_v11 = vunpack.c.l.b16 %v308_v3  ;;  %v662_v14 = vshrl.u32 %v1840_v59, 16  ;;  %v296_v61 = vld [vmem:[%s1739_s22 + $0x68] sm:$0x1] }
  0x2c   : > { %v540_v6 = vsel %vm468_vm1, %v535_v57, %v539_v58  ;;  %v736_v13 = vsel %vm721_vm0, %v734_v63, %v735_v1  ;;  %v666_v15 = vrot.slane %v664_v5, 1  ;;  %v770_v17 = vrot.slane %v1840_v59, 1 }
  0x2d   : > { %691 = vrot.lane.b32.xlu2 %v516_v39, %s1689_s24  ;;  %v669_v16 = vshll.u32 %v466_v7, 16  ;;  %v771_v18 = vrot.slane %v466_v7, 1  ;;  %v438_v19 = vunpack.c.l.b16 %v290_v8  ;;  %v737_v20 = vrot.slane %v1815_v32, 1 }
  0x2e   : > { %v738_v21 = vrot.slane %v455_v42, 1  ;;  %v462_v23 = vpack.c.b16 %v444_v11, %v444_v11  ;;  %v616_v24 = vshll.u32 %v1851_v10, 16  ;;  %v544_v29 = vshll.u32 %v1860_v22, 16  ;;  %v1892_v11 = vld [vmem:[%s1739_s22 + $0x60] sm:$0xff] }
  0x2f   : > { %v671_v26 = vrot.slane %v669_v16, 1  ;;  %v772_v30 = vsel %vm721_vm0, %v770_v17, %v771_v18  ;;  %v456_v31 = vpack.c.b16 %v438_v19, %v438_v19  ;;  %v439_v39 = vunpack.c.l.b16 %v293_v27  ;;  %v299_v18 = vld [vmem:[%s1739_s22 + $0x74] sm:$0x1]  ;;  %v1903_v19 = vld [vmem:[%s1739_s22 + $0x6c] sm:$0xff] }
  0x30   : > { %782 = vrot.lane.b32.xlu1 %v733_v25, %s1688_s23  ;;  %v667_v25 = vor.u32 %v666_v15, %v662_v14  ;;  %v739_v33 = vsel %vm721_vm0, %v737_v20, %v738_v21  ;;  %v618_v35 = vrot.slane %v616_v24, 1  ;;  %v621_v36 = vshll.u32 %v462_v23, 16  ;;  %v1590_v21 = vld [vmem:[%s2244_s2 + $0x10] sm:$0xf] }
  0x31   : > { %v542_v41 = vshrl.u32 %v1860_v22, 16  ;;  %v546_v42 = vrot.slane %v544_v29, 1  ;;  %v549_v43 = vshll.u32 %v456_v31, 16  ;;  %v740_v45 = vrot.slane %v1860_v22, 1 }
  0x32   : > { %713 = vrot.lane.b32.xlu0 %v648_v34, %s1689_s24  ;;  %v614_v34 = vshrl.u32 %v1851_v10, 16  ;;  %v672_v40 = vsel %vm468_vm1, %v667_v25, %v671_v26  ;;  %v741_v46 = vrot.slane %v456_v31, 1  ;;  %v623_v48 = vrot.slane %v621_v36, 1  ;;  %v1548_v36 = vld [vmem:[%s2244_s2 + $0x8] sm:$0xf] }
  0x33   : > { %v556_v50 = vshll.u32 %v1870_v37, 16  ;;  %v547_v51 = vor.u32 %v546_v42, %v542_v41  ;;  %v551_v52 = vrot.slane %v549_v43, 1  ;;  %v743_v62 = vrot.slane %v1870_v37, 1 }
  0x34   : > { %v619_v47 = vor.u32 %v618_v35, %v614_v34  ;;  %v742_v53 = vsel %vm721_vm0, %v740_v45, %v741_v46  ;;  %v440_v5 = vunpack.c.l.b16 %v296_v61  ;;  %v759_v7 = vrot.slane %v462_v23, 1  ;;  %v1631_v23 = vld [vmem:[%s2244_s2 + $0x10] sm:$0x30] }
  0x35   : > { %804 = vrot.lane.b32.xlu2 %v766_v56, %s1688_s23  ;;  %v554_v56 = vshrl.u32 %v1870_v37, 16  ;;  %v558_v57 = vrot.slane %v556_v50, 1  ;;  %v552_v60 = vsel %vm468_vm1, %v547_v51, %v551_v52  ;;  %v746_v15 = vrot.slane %v1892_v11, 1  ;;  %v1931_v51 = vld [vmem:[%s1739_s22 + $0x78] sm:$0xff] }
  0x36   : > { %v441_v20 = vunpack.c.l.b16 %v299_v18  ;;  %v580_v25 = vshll.u32 %v1903_v19, 16  ;;  %v1591_v26 = vor.u32 %v1631_v23, %v1590_v21  ;;  %v578_v27 = vshrl.u32 %v1903_v19, 16 }
  0x37   : > { %v559_v1 = vor.u32 %v558_v57, %v554_v56  ;;  %v566_v42 = vshrl.u32 %v1892_v11, 16  ;;  %v590_v61 = vshrl.u32 %v1931_v51, 16 }
  0x38   : > { %715 = vrot.lane.b32.xlu1 %v660_v49, %s1689_s24  ;;  %v457_v49 = vpack.c.b16 %v439_v39, %v439_v39  ;;  %v459_v24 = vpack.c.b16 %v441_v20, %v441_v20  ;;  %v582_v29 = vrot.slane %v580_v25, 1  ;;  %v1630_v39 = vld [vmem:[%s2244_s2 + $0x8] sm:$0x30]  ;;  %v1953_v20 = vld [vmem:[%s1739_s22 + $0x84] sm:$0xff] }
  0x39   : > { %v1549_v41 = vor.u32 %v1630_v39, %v1548_v36 }
  0x3a   : > { %693 = vrot.lane.b32.xlu0 %v528_v55, %s1689_s24  ;;  %v624_v55 = vsel %vm468_vm1, %v619_v47, %v623_v48  ;;  %v561_v58 = vshll.u32 %v457_v49, 16  ;;  %v744_v63 = vrot.slane %v457_v49, 1  ;;  %v585_v31 = vshll.u32 %v459_v24, 16  ;;  %v302_v49 = vld [vmem:[%s1739_s22 + $0x80] sm:$0x1] }
  0x3b   : > { %v931_v46 = vsel %vm929_vm2, %v1549_v41, 0  ;;  %v442_v52 = vunpack.c.l.b16 %v302_v49 }
  0x3c   : > { %v563_v3 = vrot.slane %v561_v58, 1  ;;  %v745_v8 = vsel %vm721_vm0, %v743_v62, %v744_v63  ;;  %v587_v34 = vrot.slane %v585_v31, 1  ;;  %1632 = vmatpush.bf16.msra.mxu3 %v931_v46  ;;  %940 = vmatpush.bf16.msra.mxu0 %v931_v46  ;;  %v592_v58 = vshll.u32 %v1931_v51, 16 }
  0x3d   : > { %784 = vrot.lane.b32.xlu2 %v736_v13, %s1688_s23  ;;  %v458_v13 = vpack.c.b16 %v440_v5, %v440_v5  ;;  %v460_v57 = vpack.c.b16 %v442_v52, %v442_v52  ;;  %v752_v5 = vrot.slane %v1931_v51, 1  ;;  %v602_v46 = vshrl.u32 %v1953_v20, 16 }
  0x3e   : > { %v594_v62 = vrot.slane %v592_v58, 1  ;;  %v1998_v58 = vld [vmem:[%s1828_s28 + $0xc] sm:$0xff] }
  0x3f   : > { %v747_v16 = vrot.slane %v458_v13, 1  ;;  %v573_v45 = vshll.u32 %v458_v13, 16  ;;  %v597_v63 = vshll.u32 %v460_v57, 16  ;;  %v749_v13 = vrot.slane %v1903_v19, 1 }
  0x40   : > { %695 = vrot.lane.b32.xlu1 %v540_v6, %s1689_s24  ;;  %v758_v6 = vrot.slane %v1851_v10, 1 }
  0x41   : > { %v748_v17 = vsel %vm721_vm0, %v746_v15, %v747_v16  ;;  %v575_v48 = vrot.slane %v573_v45, 1  ;;  %v305_v16 = vld [vmem:[%s1739_s22 + $0x8c] sm:$0x1] }
  0x42   : > { %806 = vrot.lane.b32.xlu0 %v769_v9, %s1688_s23  ;;  %v564_v9 = vsel %vm468_vm1, %v559_v1, %v563_v3  ;;  %v760_v14 = vsel %vm721_vm0, %v758_v6, %v759_v7  ;;  %v595_v1 = vor.u32 %v594_v62, %v590_v61  ;;  %v599_v3 = vrot.slane %v597_v63, 1 }
  0x43   : > { %v753_v6 = vrot.slane %v460_v57, 1  ;;  %v323_v57 = vld [vmem:[%s1828_s28 + $0x14] sm:$0x1]  ;;  %v676_v62 = vshll.u32 %v1998_v58, 16 }
  0x44   : > { %v600_v7 = vsel %vm468_vm1, %v595_v1, %v599_v3  ;;  %v674_v1 = vshrl.u32 %v1998_v58, 16 }
  0x45   : > { %717 = vrot.lane.b32.xlu2 %v672_v40, %s1689_s24  ;;  %v568_v40 = vshll.u32 %v1892_v11, 16  ;;  %v678_v3 = vrot.slane %v676_v62, 1 }
  0x47   : > { %v570_v43 = vrot.slane %v568_v40, 1 }
  0x48   : > { %808 = vrot.lane.b32.xlu1 %v772_v30, %s1688_s23  ;;  %v1914_v30 = vsel %vm929_vm2, %v1591_v26, 0  ;;  %v755_v26 = vrot.slane %v1953_v20, 1 }
  0x49   : > { %1141 = vmatpush.bf16.msra.mxu2 %v1914_v30  ;;  %v571_v47 = vor.u32 %v570_v43, %v566_v42 }
  0x4a   : > { %786 = vrot.lane.b32.xlu0 %v739_v33, %s1688_s23  ;;  %v583_v33 = vor.u32 %v582_v29, %v578_v27 }
  0x4b   : > { %v576_v50 = vsel %vm468_vm1, %v571_v47, %v575_v48 }
  0x4c   : > { %v588_v35 = vsel %vm468_vm1, %v583_v33, %v587_v34 }
  0x4d   : > { %697 = vrot.lane.b32.xlu2 %v552_v60, %s1689_s24 }
  0x50   : > { %788 = vrot.lane.b32.xlu1 %v742_v53, %s1688_s23  ;;  %v1568_v53 = vld [vmem:[%s2244_s2] sm:$0xf] }
  0x52   : > { %709 = vrot.lane.b32.xlu0 %v624_v55, %s1689_s24  ;;  %v1629_v55 = vld [vmem:[%s2244_s2] sm:$0x30] }
  0x53   : > { %v1569_v56 = vor.u32 %v1629_v55, %v1568_v53 }
  0x55   : > { %800 = vrot.lane.b32.xlu2 %v760_v14, %s1688_s23  ;;  %v1030_v60 = vsel %vm929_vm2, %v1569_v56, 0  ;;  %v750_v14 = vrot.slane %v459_v24, 1 }
  0x56   : > { %1633 = vmatpush.bf16.msrb.mxu3 %v1030_v60  ;;  %1039 = vmatpush.bf16.msra.mxu1 %v1030_v60  ;;  %v449_v60 = vunpack.c.l.b16 %v323_v57  ;;  %v2085_v57 = vld [vmem:[%s2245_s3] ss:$0 sm:$0xff] }
  0x57   : > { %v751_v15 = vsel %vm721_vm0, %v749_v13, %v750_v14 }
  0x58   : > { %790 = vrot.lane.b32.xlu1 %v745_v8, %s1688_s23  ;;  %v754_v8 = vsel %vm721_vm0, %v752_v5, %v753_v6  ;;  %v467_v61 = vpack.c.b16 %v449_v60, %v449_v60 }
  0x5a   : > { %699 = vrot.lane.b32.xlu0 %v564_v9, %s1689_s24  ;;  %v681_v5 = vshll.u32 %v467_v61, 16 }
  0x5d   : > { %701 = vrot.lane.b32.xlu2 %v576_v50, %s1689_s24 }
  0x60   : > { %703 = vrot.lane.b32.xlu1 %v588_v35, %s1689_s24 }
  0x62   : > { %792 = vrot.lane.b32.xlu0 %v748_v17, %s1688_s23  ;;  %v443_v17 = vunpack.c.l.b16 %v305_v16 }
  0x64   : > { %v461_v21 = vpack.c.b16 %v443_v17, %v443_v17 }
  0x65   : > { %794 = vrot.lane.b32.xlu2 %v751_v15, %s1688_s23 }
  0x66   : > { %v756_v24 = vrot.slane %v461_v21, 1  ;;  %v609_v48 = vshll.u32 %v461_v21, 16 }
  0x68   : > { %796 = vrot.lane.b32.xlu1 %v754_v8, %s1688_s23  ;;  %v757_v31 = vsel %vm721_vm0, %v755_v26, %v756_v24  ;;  %v611_v53 = vrot.slane %v609_v48, 1  ;;  %v679_v8 = vor.u32 %v678_v3, %v674_v1 }
  0x6a   : > { %705 = vrot.lane.b32.xlu0 %v600_v7, %s1689_s24 }
  0x72   : > { %798 = vrot.lane.b32.xlu0 %v757_v31, %s1688_s23  ;;  %v774_v31 = vrot.slane %v467_v61, 1 }
  0x77   : > { %v686_v9 = vpop.permute.xlu2 %685 }
  0x78   : > { %v814_v42 = vsel %vm812_vm3, %v1762_v28, %v686_v9  ;;  %v683_v9 = vrot.slane %v681_v5, 1 }
  0x7a   : > { %v684_v14 = vsel %vm468_vm1, %v679_v8, %v683_v9 }
  0x7b   : > { %719 = vrot.lane.b32.xlu1 %v684_v14, %s1689_s24 }
  0x7f   : > { %v688_v29 = vpop.permute.xlu2 %687 }
  0x80   : > { %v816_v36 = vsel %vm812_vm3, %v1770_v38, %v688_v29  ;;  %v604_v38 = vshll.u32 %v1953_v20, 16 }
  0x82   : > { %v606_v47 = vrot.slane %v604_v38, 1 }
  0x84   : > { %v607_v52 = vor.u32 %v606_v47, %v602_v46 }
  0x86   : > { %v612_v56 = vsel %vm468_vm1, %v607_v52, %v611_v53 }
  0x87   : > { %v692_v39 = vpop.permute.xlu2 %691  ;;  %707 = vrot.lane.b32.xlu2 %v612_v56, %s1689_s24  ;;  %s2096_s24 = scalar_lea.vmem %s2246_s4, %s1610_s21 }
  0x88   : > { %v820_v45 = vsel %vm812_vm3, %v1783_v54, %v692_v39 }
  0x8a   : > { %v781_v18 = vpop.permute.xlu1 %780 }
  0x8c   : > { %v690_v23 = vpop.permute.xlu0 %689 }
  0x8d   : > { %v818_v25 = vsel %vm812_vm3, %v1742_v0, %v690_v23 }
  0x8e   : > { %v1959_v27 = vsel %vm849_vm4, %v818_v25, %v781_v18 }
  0x8f   : > { %1592 = vmatmul.msk.bf16.vlgmr.msra.gmra.mxu2 %vm896_vm5, %v1959_v27  ;;  %v805_v49 = vpop.permute.xlu2 %804 }
  0x92   : > { %v803_v33 = vpop.permute.xlu1 %802 }
  0x94   : > { %v712_v34 = vpop.permute.xlu0 %711 }
  0x95   : > { %v840_v35 = vsel %vm812_vm3, %v1746_v2, %v712_v34 }
  0x96   : > { %v1968_v0 = vsel %vm849_vm4, %v840_v35, %v803_v33 }
  0x97   : > { %1562 = vmatmul.msk.bf16.vlgmr.msra.gmra.mxu3 %vm896_vm5, %v1968_v0  ;;  %v785_v7 = vpop.permute.xlu2 %784 }
  0x98   : > { %1634 = vmatpush.bf16.msra.mxu3 %v1914_v30 }
  0x9a   : > { %v779_v40 = vpop.permute.xlu1 %778 }
  0x9b   : > { %v853_v41 = vsel %vm849_vm4, %v816_v36, %v779_v40 }
  0x9c   : > { %v777_v43 = vpop.permute.xlu0 %776  ;;  %1550 = vmatmul.msk.bf16.vlgmr.msra.gmra.mxu0 %vm896_vm5, %v853_v41 }
  0x9d   : > { %v851_v2 = vsel %vm849_vm4, %v814_v42, %v777_v43 }
  0x9e   : > { %1570 = vmatmul.msk.bf16.vlgmr.msra.gmra.mxu1 %vm896_vm5, %v851_v2 }
  0x9f   : > { %v718_v18 = vpop.permute.xlu2 %717 }
  0xa0   : > { %v846_v25 = vsel %vm812_vm3, %v1840_v59, %v718_v18 }
  0xa2   : > { %v783_v30 = vpop.permute.xlu1 %782 }
  0xa3   : > { %v857_v28 = vsel %vm849_vm4, %v820_v45, %v783_v30 }
  0xa4   : > { %v714_v50 = vpop.permute.xlu0 %713  ;;  %1593 = vmatmul.msk.bf16.gmra.mxu2 %vm896_vm5, %v857_v28 }
  0xa5   : > { %v842_v54 = vsel %vm812_vm3, %v1774_v44, %v714_v50 }
  0xa6   : > { %v1990_v55 = vsel %vm849_vm4, %v842_v54, %v805_v49 }
  0xa7   : > { %1563 = vmatmul.msk.bf16.gmra.mxu3 %vm896_vm5, %v1990_v55  ;;  %v698_v29 = vpop.permute.xlu2 %697 }
  0xa8   : > { %v826_v59 = vsel %vm812_vm3, %v1860_v22, %v698_v29 }
  0xaa   : > { %v716_v63 = vpop.permute.xlu1 %715 }
  0xab   : > { %v844_v15 = vsel %vm812_vm3, %v1795_v4, %v716_v63 }
  0xac   : > { %1551 = vmatmul.msk.bf16.gmra.mxu0 %vm896_vm5, %v1959_v27  ;;  %v694_v44 = vpop.permute.xlu0 %693 }
  0xad   : > { %v822_v6 = vsel %vm812_vm3, %v1802_v12, %v694_v44 }
  0xae   : > { %1571 = vmatmul.msk.bf16.gmra.mxu1 %vm896_vm5, %v853_v41  ;;  %v859_v13 = vsel %vm849_vm4, %v822_v6, %v785_v7 }
  0xaf   : > { %v801_v39 = vpop.permute.xlu2 %800 }
  0xb2   : > { %v696_v12 = vpop.permute.xlu1 %695 }
  0xb3   : > { %v824_v21 = vsel %vm812_vm3, %v1815_v32, %v696_v12  ;;  %v773_v32 = vrot.slane %v1998_v58, 1 }
  0xb4   : > { %1594 = vmatmul.msk.bf16.gmra.mxu2 %vm896_vm5, %v859_v13  ;;  %v807_v16 = vpop.permute.xlu0 %806 }
  0xb5   : > { %v2014_v17 = vsel %vm849_vm4, %v844_v15, %v807_v16 }
  0xb7   : > { %1564 = vmatmul.msk.bf16.gmra.mxu3 %vm896_vm5, %v2014_v17  ;;  %v702_v43 = vpop.permute.xlu2 %701 }
  0xb8   : > { %v830_v2 = vsel %vm812_vm3, %v1892_v11, %v702_v43 }
  0xba   : > { %v809_v26 = vpop.permute.xlu1 %808 }
  0xbb   : > { %v2028_v24 = vsel %vm849_vm4, %v846_v25, %v809_v26 }
  0xbc   : > { %1552 = vmatmul.msk.bf16.gmra.mxu0 %vm896_vm5, %v857_v28  ;;  %v787_v4 = vpop.permute.xlu0 %786 }
  0xbd   : > { %v861_v23 = vsel %vm849_vm4, %v824_v21, %v787_v4 }
  0xbe   : > { %1572 = vmatmul.msk.bf16.gmra.mxu1 %vm896_vm5, %v1959_v27  ;;  %v775_v27 = vsel %vm721_vm0, %v773_v32, %v774_v31 }
  0xbf   : > { %810 = vrot.lane.b32.xlu2 %v775_v27, %s1688_s23  ;;  %v795_v46 = vpop.permute.xlu2 %794 }
  0xc2   : > { %v789_v33 = vpop.permute.xlu1 %788 }
  0xc3   : > { %v863_v36 = vsel %vm849_vm4, %v826_v59, %v789_v33 }
  0xc4   : > { %1595 = vmatmul.msk.bf16.gmra.mxu2 %vm896_vm5, %v861_v23  ;;  %v710_v34 = vpop.permute.xlu0 %709 }
  0xc5   : > { %v838_v35 = vsel %vm812_vm3, %v1851_v10, %v710_v34 }
  0xc6   : > { %v2044_v40 = vsel %vm849_vm4, %v838_v35, %v801_v39 }
  0xc7   : > { %1565 = vmatmul.msk.bf16.gmra.mxu3 %vm896_vm5, %v2028_v24 }
  0xca   : > { %v791_v10 = vpop.permute.xlu1 %790 }
  0xcc   : > { %1553 = vmatmul.msk.bf16.gmra.mxu0 %vm896_vm5, %v859_v13  ;;  %v700_v41 = vpop.permute.xlu0 %699 }
  0xcd   : > { %v828_v22 = vsel %vm812_vm3, %v1870_v37, %v700_v41 }
  0xce   : > { %1573 = vmatmul.msk.bf16.gmra.mxu1 %vm896_vm5, %v857_v28  ;;  %v865_v42 = vsel %vm849_vm4, %v828_v22, %v791_v10 }
  0xd2   : > { %v704_v37 = vpop.permute.xlu1 %703 }
  0xd3   : > { %v832_v30 = vsel %vm812_vm3, %v1903_v19, %v704_v37 }
  0xd4   : > { %1596 = vmatmul.msk.bf16.gmra.mxu2 %vm896_vm5, %v863_v36  ;;  %v793_v45 = vpop.permute.xlu0 %792  ;;  %v869_v47 = vsel %vm849_vm4, %v832_v30, %v795_v46 }
  0xd5   : > { %v867_v38 = vsel %vm849_vm4, %v830_v2, %v793_v45 }
  0xd7   : > { %1582 = vmatmul.msk.bf16.vlgmr.msrb.gmra.mxu3 %vm896_vm5, %v2044_v40 }
  0xda   : > { %v797_v28 = vpop.permute.xlu1 %796 }
  0xdc   : > { %1554 = vmatmul.msk.bf16.gmra.mxu0 %vm896_vm5, %v861_v23  ;;  %v706_v11 = vpop.permute.xlu0 %705 }
  0xdd   : > { %v834_v48 = vsel %vm812_vm3, %v1931_v51, %v706_v11 }
  0xde   : > { %1574 = vmatmul.msk.bf16.gmra.mxu1 %vm896_vm5, %v859_v13  ;;  %v871_v19 = vsel %vm849_vm4, %v834_v48, %v797_v28 }
  0xe1   : > { %v708_v54 = vpop.permute.xlu2 %707 }
  0xe4   : > { %1597 = vmatmul.msk.bf16.gmra.mxu2 %vm896_vm5, %v865_v42  ;;  %v799_v60 = vpop.permute.xlu0 %798 }
  0xe7   : > { %1583 = vmatmul.msk.bf16.gmra.mxu3 %vm896_vm5, %v1968_v0 }
  0xec   : > { %1555 = vmatmul.msk.bf16.gmra.mxu0 %vm896_vm5, %v863_v36 }
  0xed   : > { %v720_v39 = vpop.permute.xlu1 %719 }
  0xee   : > { %1575 = vmatmul.msk.bf16.gmra.mxu1 %vm896_vm5, %v861_v23  ;;  %v848_v10 = vsel %vm812_vm3, %v1998_v58, %v720_v39 }
  0xf4   : > { %1598 = vmatmul.msk.bf16.gmra.mxu2 %vm896_vm5, %v867_v38 }
  0xf7   : > { %1584 = vmatmul.msk.bf16.gmra.mxu3 %vm896_vm5, %v1990_v55 }
  0xfc   : > { %1556 = vmatmul.msk.bf16.gmra.mxu0 %vm896_vm5, %v865_v42 }
  0xfe   : > { %1576 = vmatmul.msk.bf16.gmra.mxu1 %vm896_vm5, %v863_v36 }
 0x104   : > { %1599 = vmatmul.msk.bf16.gmra.mxu2 %vm896_vm5, %v869_v47 }
 0x107   : > { %1585 = vmatmul.msk.bf16.gmra.mxu3 %vm896_vm5, %v2014_v17 }
 0x10c   : > { %1557 = vmatmul.msk.bf16.gmra.mxu0 %vm896_vm5, %v867_v38 }
 0x10e   : > { %1577 = vmatmul.msk.bf16.gmra.mxu1 %vm896_vm5, %v865_v42 }
 0x112   : > { %v1143_v49 = vpop.f32.mrf.mxu2 }
 0x114   : > { %1600 = vmatmul.msk.bf16.gmra.mxu2 %vm896_vm5, %v871_v19 }
 0x117   : > { %1604 = vmatmul.msk.bf16.vlgmr.msra.gmra.mxu3 %vm896_vm5, %v1990_v55  ;;  %v836_v55 = vsel %vm812_vm3, %v1953_v20, %v708_v54 }
 0x118   : > { %v2099_v63 = vsel %vm849_vm4, %v836_v55, %v799_v60 }
 0x119   : > { %v942_v50 = vpop.f32.mrf.mxu0  ;;  %v811_v42 = vpop.permute.xlu2 %810 }
 0x11a   : > { %v2080_v52 = vpop.f32.mrf.mxu3  ;;  %v1145_v61 = vpop.f32.mrf.mxu2  ;;  %v885_v37 = vsel %vm849_vm4, %v848_v10, %v811_v42 }
 0x11b   : > { %v1041_v53 = vpop.f32.mrf.mxu1 }
 0x11c   : > { %v1042_v56 = vadd.f32 %v1041_v53, %v942_v50  ;;  %1558 = vmatmul.msk.bf16.gmra.mxu0 %vm896_vm5, %v869_v47 }
 0x11e   : > { %v1223_v51 = vadd.f32 %v1143_v49, %v1042_v56  ;;  %1578 = vmatmul.msk.bf16.gmra.mxu1 %vm896_vm5, %v867_v38 }
 0x120   : > { %v1259_v62 = vadd.f32 %v2085_v57, %v1223_v51 }
 0x121   : > { %v944_v44 = vpop.f32.mrf.mxu0 }
 0x122   : > { %v1291_v1 = vmax.f32 %v1259_v62, 0.0  ;;  %v2101_v3 = vpop.f32.mrf.mxu3 }
 0x123   : > { %v1043_v5 = vpop.f32.mrf.mxu1 }
 0x124   : > { %1323 = vst [vmem:[%s2096_s24] sm:$0xff] %v1291_v1  ;;  %v1044_v20 = vadd.f32 %v1043_v5, %v944_v44  ;;  %1601 = vmatmul.msk.bf16.gmra.mxu2 %vm896_vm5, %v2099_v63 }
 0x126   : > { %v1224_v6 = vadd.f32 %v1145_v61, %v1044_v20 }
 0x127   : > { %v1148_v7 = vpop.f32.mrf.mxu2  ;;  %1605 = vmatmul.msk.bf16.gmra.mxu3 %vm896_vm5, %v2014_v17 }
 0x128   : > { %v1260_v8 = vadd.f32 %v2085_v57, %v1224_v6 }
 0x129   : > { %v947_v9 = vpop.f32.mrf.mxu0 }
 0x12a   : > { %v1292_v13 = vmax.f32 %v1260_v8, 0.0  ;;  %v2109_v14 = vpop.f32.mrf.mxu3 }
 0x12b   : > { %v1046_v15 = vpop.f32.mrf.mxu1 }
 0x12c   : > { %1324 = vst [vmem:[%s2096_s24 + $0x8] sm:$0xff] %v1292_v13  ;;  %v1047_v16 = vadd.f32 %v1046_v15, %v947_v9  ;;  %1559 = vmatmul.msk.bf16.gmra.mxu0 %vm896_vm5, %v871_v19 }
 0x12e   : > { %v1225_v12 = vadd.f32 %v1148_v7, %v1047_v16  ;;  %1579 = vmatmul.msk.bf16.gmra.mxu1 %vm896_vm5, %v869_v47 }
 0x12f   : > { %v1150_v18 = vpop.f32.mrf.mxu2 }
 0x130   : > { %v1261_v21 = vadd.f32 %v2085_v57, %v1225_v12 }
 0x131   : > { %v949_v17 = vpop.f32.mrf.mxu0 }
 0x132   : > { %v1293_v4 = vmax.f32 %v1261_v21, 0.0  ;;  %v2115_v23 = vpop.f32.mrf.mxu3 }
 0x133   : > { %v1048_v25 = vpop.f32.mrf.mxu1 }
 0x134   : > { %1325 = vst [vmem:[%s2096_s24 + $0x10] sm:$0xff] %v1293_v4  ;;  %v1049_v26 = vadd.f32 %v1048_v25, %v949_v17  ;;  %1602 = vmatmul.msk.bf16.gmra.mxu2 %vm896_vm5, %v2044_v40 }
 0x136   : > { %v1226_v29 = vadd.f32 %v1150_v18, %v1049_v26 }
 0x137   : > { %v1153_v32 = vpop.f32.mrf.mxu2  ;;  %1606 = vmatmul.msk.bf16.gmra.mxu3 %vm896_vm5, %v2028_v24 }
 0x138   : > { %v1262_v31 = vadd.f32 %v2085_v57, %v1226_v29 }
 0x139   : > { %v952_v27 = vpop.f32.mrf.mxu0 }
 0x13a   : > { %v1294_v59 = vmax.f32 %v1262_v31, 0.0  ;;  %v2123_v33 = vpop.f32.mrf.mxu3 }
 0x13b   : > { %v1051_v34 = vpop.f32.mrf.mxu1 }
 0x13c   : > { %1326 = vst [vmem:[%s2096_s24 + $0x18] sm:$0xff] %v1294_v59  ;;  %v1052_v35 = vadd.f32 %v1051_v34, %v952_v27  ;;  %1560 = vmatmul.msk.bf16.gmra.mxu0 %vm896_vm5, %v2099_v63 }
 0x13e   : > { %v1227_v36 = vadd.f32 %v1153_v32, %v1052_v35  ;;  %1580 = vmatmul.msk.bf16.gmra.mxu1 %vm896_vm5, %v871_v19 }
 0x13f   : > { %v1155_v41 = vpop.f32.mrf.mxu2 }
 0x140   : > { %v1263_v24 = vadd.f32 %v2085_v57, %v1227_v36 }
 0x141   : > { %v954_v22 = vpop.f32.mrf.mxu0 }
 0x142   : > { %v1295_v43 = vmax.f32 %v1263_v24, 0.0  ;;  %v2132_v2 = vpop.f32.mrf.mxu3 }
 0x143   : > { %v1053_v45 = vpop.f32.mrf.mxu1 }
 0x144   : > { %1327 = vst [vmem:[%s2096_s24 + $0x20] sm:$0xff] %v1295_v43  ;;  %v1054_v38 = vadd.f32 %v1053_v45, %v954_v22  ;;  %1603 = vmatmul.msk.bf16.gmra.mxu2 %vm896_vm5, %v1968_v0 }
 0x146   : > { %v1228_v30 = vadd.f32 %v1155_v41, %v1054_v38 }
 0x147   : > { %v1158_v46 = vpop.f32.mrf.mxu2  ;;  %1607 = vmatmul.msk.bf16.gmra.mxu3 %vm896_vm5, %v885_v37 }
 0x148   : > { %v1264_v47 = vadd.f32 %v2085_v57, %v1228_v30 }
 0x149   : > { %v957_v58 = vpop.f32.mrf.mxu0 }
 0x14a   : > { %v1296_v11 = vmax.f32 %v1264_v47, 0.0  ;;  %v2140_v48 = vpop.f32.mrf.mxu3 }
 0x14b   : > { %v1056_v28 = vpop.f32.mrf.mxu1 }
 0x14c   : > { %1328 = vst [vmem:[%s2096_s24 + $0x28] sm:$0xff] %v1296_v11  ;;  %v1057_v19 = vadd.f32 %v1056_v28, %v957_v58  ;;  %1561 = vmatmul.msk.bf16.gmra.mxu0 %vm896_vm5, %v2044_v40 }
 0x14e   : > { %v1229_v0 = vadd.f32 %v1158_v46, %v1057_v19  ;;  %1581 = vmatmul.msk.bf16.gmra.mxu1 %vm896_vm5, %v2099_v63 }
 0x14f   : > { %v1160_v49 = vpop.f32.mrf.mxu2 }
 0x150   : > { %v1265_v50 = vadd.f32 %v2085_v57, %v1229_v0 }
 0x151   : > { %v959_v53 = vpop.f32.mrf.mxu0 }
 0x152   : > { %v1297_v54 = vmax.f32 %v1265_v50, 0.0  ;;  %v2148_v56 = vpop.f32.mrf.mxu3 }
 0x153   : > { %v1058_v51 = vpop.f32.mrf.mxu1 }
 0x154   : > { %1329 = vst [vmem:[%s2096_s24 + $0x30] sm:$0xff] %v1297_v54  ;;  %v1059_v55 = vadd.f32 %v1058_v51, %v959_v53 }
 0x156   : > { %v1230_v60 = vadd.f32 %v1160_v49, %v1059_v55 }
 0x157   : > { %v1163_v61 = vpop.f32.mrf.mxu2 }
 0x158   : > { %v1266_v40 = vadd.f32 %v2085_v57, %v1230_v60 }
 0x159   : > { %v962_v62 = vpop.f32.mrf.mxu0 }
 0x15a   : > { %v1298_v44 = vmax.f32 %v1266_v40, 0.0  ;;  %v2152_v1 = vpop.f32.mrf.mxu3 }
 0x15b   : > { %v1061_v63 = vpop.f32.mrf.mxu1 }
 0x15c   : > { %1330 = vst [vmem:[%s2096_s24 + $0x38] sm:$0xff] %v1298_v44  ;;  %v1062_v5 = vadd.f32 %v1061_v63, %v962_v62 }
 0x15e   : > { %v1231_v20 = vadd.f32 %v1163_v61, %v1062_v5 }
 0x15f   : > { %v1165_v6 = vpop.f32.mrf.mxu2 }
 0x160   : > { %v1267_v7 = vadd.f32 %v2085_v57, %v1231_v20 }
 0x161   : > { %v964_v8 = vpop.f32.mrf.mxu0 }
 0x162   : > { %v1299_v9 = vmax.f32 %v1267_v7, 0.0  ;;  %v2156_v13 = vpop.f32.mrf.mxu3 }
 0x163   : > { %v1063_v15 = vpop.f32.mrf.mxu1 }
 0x164   : > { %1331 = vst [vmem:[%s2096_s24 + $0x40] sm:$0xff] %v1299_v9  ;;  %v1064_v16 = vadd.f32 %v1063_v15, %v964_v8  ;;  %v1102_v15 = vadd.f32 %v2152_v1, %v2080_v52 }
 0x166   : > { %v1232_v12 = vadd.f32 %v1165_v6, %v1064_v16 }
 0x167   : > { %v1168_v18 = vpop.f32.mrf.mxu2 }
 0x168   : > { %v1268_v21 = vadd.f32 %v2085_v57, %v1232_v12 }
 0x169   : > { %v967_v17 = vpop.f32.mrf.mxu0 }
 0x16a   : > { %v1300_v4 = vmax.f32 %v1268_v21, 0.0  ;;  %v2160_v25 = vpop.f32.mrf.mxu3 }
 0x16b   : > { %v1066_v26 = vpop.f32.mrf.mxu1 }
 0x16c   : > { %1332 = vst [vmem:[%s2096_s24 + $0x48] sm:$0xff] %v1300_v4  ;;  %v1067_v29 = vadd.f32 %v1066_v26, %v967_v17 }
 0x16e   : > { %v1233_v32 = vadd.f32 %v1168_v18, %v1067_v29 }
 0x16f   : > { %v1170_v31 = vpop.f32.mrf.mxu2 }
 0x170   : > { %v1269_v27 = vadd.f32 %v2085_v57, %v1233_v32 }
 0x171   : > { %v969_v59 = vpop.f32.mrf.mxu0 }
 0x172   : > { %v1301_v34 = vmax.f32 %v1269_v27, 0.0  ;;  %v2164_v35 = vpop.f32.mrf.mxu3 }
 0x173   : > { %v1068_v36 = vpop.f32.mrf.mxu1 }
 0x174   : > { %1333 = vst [vmem:[%s2096_s24 + $0x50] sm:$0xff] %v1301_v34  ;;  %v1069_v39 = vadd.f32 %v1068_v36, %v969_v59  ;;  %v1104_v59 = vadd.f32 %v2156_v13, %v2101_v3  ;;  %v1107_v3 = vadd.f32 %v2160_v25, %v2109_v14  ;;  %v1109_v14 = vadd.f32 %v2164_v35, %v2115_v23 }
 0x176   : > { %v1234_v41 = vadd.f32 %v1170_v31, %v1069_v39 }
 0x177   : > { %v1173_v24 = vpop.f32.mrf.mxu2 }
 0x178   : > { %v1270_v22 = vadd.f32 %v2085_v57, %v1234_v41 }
 0x179   : > { %v972_v10 = vpop.f32.mrf.mxu0 }
 0x17a   : > { %v1302_v42 = vmax.f32 %v1270_v22, 0.0  ;;  %v2168_v43 = vpop.f32.mrf.mxu3 }
 0x17b   : > { %v1071_v45 = vpop.f32.mrf.mxu1  ;;  %v1112_v23 = vadd.f32 %v2168_v43, %v2123_v33 }
 0x17c   : > { %1334 = vst [vmem:[%s2096_s24 + $0x58] sm:$0xff] %v1302_v42  ;;  %v1072_v38 = vadd.f32 %v1071_v45, %v972_v10 }
 0x17e   : > { %v1235_v37 = vadd.f32 %v1173_v24, %v1072_v38 }
 0x17f   : > { %v1175_v30 = vpop.f32.mrf.mxu2 }
 0x180   : > { %v1271_v46 = vadd.f32 %v2085_v57, %v1235_v37 }
 0x181   : > { %v974_v47 = vpop.f32.mrf.mxu0 }
 0x182   : > { %v1303_v58 = vmax.f32 %v1271_v46, 0.0  ;;  %v2172_v11 = vpop.f32.mrf.mxu3 }
 0x183   : > { %v1073_v28 = vpop.f32.mrf.mxu1 }
 0x184   : > { %1335 = vst [vmem:[%s2096_s24 + $0x60] sm:$0xff] %v1303_v58  ;;  %v1074_v19 = vadd.f32 %v1073_v28, %v974_v47 }
 0x186   : > { %v1236_v0 = vadd.f32 %v1175_v30, %v1074_v19 }
 0x187   : > { %v1178_v49 = vpop.f32.mrf.mxu2 }
 0x188   : > { %v1272_v50 = vadd.f32 %v2085_v57, %v1236_v0 }
 0x189   : > { %v977_v53 = vpop.f32.mrf.mxu0 }
 0x18a   : > { %v1304_v54 = vmax.f32 %v1272_v50, 0.0  ;;  %v2176_v51 = vpop.f32.mrf.mxu3 }
 0x18b   : > { %v1076_v55 = vpop.f32.mrf.mxu1 }
 0x18c   : > { %1336 = vst [vmem:[%s2096_s24 + $0x68] sm:$0xff] %v1304_v54  ;;  %v1077_v60 = vadd.f32 %v1076_v55, %v977_v53 }
 0x18e   : > { %v1237_v61 = vadd.f32 %v1178_v49, %v1077_v60 }
 0x18f   : > { %v1180_v40 = vpop.f32.mrf.mxu2 }
 0x190   : > { %v1273_v62 = vadd.f32 %v2085_v57, %v1237_v61 }
 0x191   : > { %v979_v44 = vpop.f32.mrf.mxu0 }
 0x192   : > { %v1305_v63 = vmax.f32 %v1273_v62, 0.0  ;;  %v2180_v5 = vpop.f32.mrf.mxu3 }
 0x193   : > { %v1078_v20 = vpop.f32.mrf.mxu1 }
 0x194   : > { %1337 = vst [vmem:[%s2096_s24 + $0x70] sm:$0xff] %v1305_v63  ;;  %v1079_v6 = vadd.f32 %v1078_v20, %v979_v44 }
 0x196   : > { %v1238_v7 = vadd.f32 %v1180_v40, %v1079_v6 }
 0x197   : > { %v1183_v8 = vpop.f32.mrf.mxu2 }
 0x198   : > { %v1274_v9 = vadd.f32 %v2085_v57, %v1238_v7 }
 0x199   : > { %v982_v16 = vpop.f32.mrf.mxu0 }
 0x19a   : > { %v1306_v12 = vmax.f32 %v1274_v9, 0.0  ;;  %v1203_v18 = vpop.f32.mrf.mxu3 }
 0x19b   : > { %v1247_v21 = vadd.f32 %v1203_v18, %v1102_v15  ;;  %v1081_v17 = vpop.f32.mrf.mxu1 }
 0x19c   : > { %1338 = vst [vmem:[%s2096_s24 + $0x78] sm:$0xff] %v1306_v12  ;;  %v1082_v4 = vadd.f32 %v1081_v17, %v982_v16 }
 0x19d   : > { %v1283_v26 = vadd.f32 %v2085_v57, %v1247_v21  ;;  %v1114_v21 = vadd.f32 %v2172_v11, %v2132_v2  ;;  %v1117_v2 = vadd.f32 %v2176_v51, %v2140_v48  ;;  %v1119_v48 = vadd.f32 %v2180_v5, %v2148_v56 }
 0x19e   : > { %v1239_v29 = vadd.f32 %v1183_v8, %v1082_v4 }
 0x19f   : > { %v1315_v32 = vmax.f32 %v1283_v26, 0.0  ;;  %v1185_v31 = vpop.f32.mrf.mxu2 }
 0x1a0   : > { %v1275_v27 = vadd.f32 %v2085_v57, %v1239_v29 }
 0x1a1   : > { %1347 = vst [vmem:[%s2096_s24 + $0xc0] sm:$0xff] %v1315_v32  ;;  %v984_v52 = vpop.f32.mrf.mxu0 }
 0x1a2   : > { %v1307_v1 = vmax.f32 %v1275_v27, 0.0  ;;  %v1205_v34 = vpop.f32.mrf.mxu3 }
 0x1a3   : > { %v1248_v36 = vadd.f32 %v1205_v34, %v1104_v59  ;;  %v1083_v39 = vpop.f32.mrf.mxu1 }
 0x1a4   : > { %1339 = vst [vmem:[%s2096_s24 + $0x80] sm:$0xff] %v1307_v1  ;;  %v1084_v41 = vadd.f32 %v1083_v39, %v984_v52 }
 0x1a5   : > { %v1284_v24 = vadd.f32 %v2085_v57, %v1248_v36 }
 0x1a6   : > { %v1240_v22 = vadd.f32 %v1185_v31, %v1084_v41 }
 0x1a7   : > { %v1316_v10 = vmax.f32 %v1284_v24, 0.0  ;;  %v1188_v42 = vpop.f32.mrf.mxu2 }
 0x1a8   : > { %v1276_v45 = vadd.f32 %v2085_v57, %v1240_v22 }
 0x1a9   : > { %1348 = vst [vmem:[%s2096_s24 + $0xc8] sm:$0xff] %v1316_v10  ;;  %v987_v13 = vpop.f32.mrf.mxu0 }
 0x1aa   : > { %v1308_v38 = vmax.f32 %v1276_v45, 0.0  ;;  %v1208_v37 = vpop.f32.mrf.mxu3 }
 0x1ab   : > { %v1249_v30 = vadd.f32 %v1208_v37, %v1107_v3  ;;  %v1086_v46 = vpop.f32.mrf.mxu1 }
 0x1ac   : > { %1340 = vst [vmem:[%s2096_s24 + $0x88] sm:$0xff] %v1308_v38  ;;  %v1087_v47 = vadd.f32 %v1086_v46, %v987_v13 }
 0x1ad   : > { %v1285_v58 = vadd.f32 %v2085_v57, %v1249_v30 }
 0x1ae   : > { %v1241_v28 = vadd.f32 %v1188_v42, %v1087_v47 }
 0x1af   : > { %v1317_v19 = vmax.f32 %v1285_v58, 0.0  ;;  %v1190_v0 = vpop.f32.mrf.mxu2 }
 0x1b0   : > { %v1277_v49 = vadd.f32 %v2085_v57, %v1241_v28 }
 0x1b1   : > { %1349 = vst [vmem:[%s2096_s24 + $0xd0] sm:$0xff] %v1317_v19  ;;  %v989_v25 = vpop.f32.mrf.mxu0 }
 0x1b2   : > { %v1309_v50 = vmax.f32 %v1277_v49, 0.0  ;;  %v1210_v53 = vpop.f32.mrf.mxu3 }
 0x1b3   : > { %v1250_v54 = vadd.f32 %v1210_v53, %v1109_v14  ;;  %v1088_v55 = vpop.f32.mrf.mxu1 }
 0x1b4   : > { %1341 = vst [vmem:[%s2096_s24 + $0x90] sm:$0xff] %v1309_v50  ;;  %v1089_v60 = vadd.f32 %v1088_v55, %v989_v25 }
 0x1b5   : > { %v1286_v61 = vadd.f32 %v2085_v57, %v1250_v54 }
 0x1b6   : > { %v1242_v40 = vadd.f32 %v1190_v0, %v1089_v60 }
 0x1b7   : > { %v1318_v62 = vmax.f32 %v1286_v61, 0.0  ;;  %v1193_v44 = vpop.f32.mrf.mxu2 }
 0x1b8   : > { %v1278_v63 = vadd.f32 %v2085_v57, %v1242_v40 }
 0x1b9   : > { %1350 = vst [vmem:[%s2096_s24 + $0xd8] sm:$0xff] %v1318_v62  ;;  %v992_v35 = vpop.f32.mrf.mxu0 }
 0x1ba   : > { %v1310_v20 = vmax.f32 %v1278_v63, 0.0  ;;  %v1213_v6 = vpop.f32.mrf.mxu3 }
 0x1bb   : > { %v1251_v7 = vadd.f32 %v1213_v6, %v1112_v23  ;;  %v1091_v8 = vpop.f32.mrf.mxu1 }
 0x1bc   : > { %1342 = vst [vmem:[%s2096_s24 + $0x98] sm:$0xff] %v1310_v20  ;;  %v1092_v9 = vadd.f32 %v1091_v8, %v992_v35 }
 0x1bd   : > { %v1287_v15 = vadd.f32 %v2085_v57, %v1251_v7 }
 0x1be   : > { %v1243_v16 = vadd.f32 %v1193_v44, %v1092_v9 }
 0x1bf   : > { %v1319_v12 = vmax.f32 %v1287_v15, 0.0  ;;  %v1195_v33 = vpop.f32.mrf.mxu2 }
 0x1c0   : > { %v1279_v18 = vadd.f32 %v2085_v57, %v1243_v16 }
 0x1c1   : > { %1351 = vst [vmem:[%s2096_s24 + $0xe0] sm:$0xff] %v1319_v12  ;;  %v994_v43 = vpop.f32.mrf.mxu0 }
 0x1c2   : > { %v1311_v17 = vmax.f32 %v1279_v18, 0.0  ;;  %v1215_v4 = vpop.f32.mrf.mxu3 }
 0x1c3   : > { %v1252_v26 = vadd.f32 %v1215_v4, %v1114_v21  ;;  %v1093_v29 = vpop.f32.mrf.mxu1 }
 0x1c4   : > { %1343 = vst [vmem:[%s2096_s24 + $0xa0] sm:$0xff] %v1311_v17  ;;  %v1094_v32 = vadd.f32 %v1093_v29, %v994_v43 }
 0x1c5   : > { %v1288_v31 = vadd.f32 %v2085_v57, %v1252_v26 }
 0x1c6   : > { %v1244_v27 = vadd.f32 %v1195_v33, %v1094_v32 }
 0x1c7   : > { %v1320_v59 = vmax.f32 %v1288_v31, 0.0  ;;  %v1198_v36 = vpop.f32.mrf.mxu2 }
 0x1c8   : > { %v1280_v52 = vadd.f32 %v2085_v57, %v1244_v27 }
 0x1c9   : > { %1352 = vst [vmem:[%s2096_s24 + $0xe8] sm:$0xff] %v1320_v59  ;;  %v997_v11 = vpop.f32.mrf.mxu0 }
 0x1ca   : > { %v1312_v1 = vmax.f32 %v1280_v52, 0.0  ;;  %v1218_v34 = vpop.f32.mrf.mxu3 }
 0x1cb   : > { %v1253_v39 = vadd.f32 %v1218_v34, %v1117_v2  ;;  %v1096_v41 = vpop.f32.mrf.mxu1 }
 0x1cc   : > { %1344 = vst [vmem:[%s2096_s24 + $0xa8] sm:$0xff] %v1312_v1  ;;  %v1097_v24 = vadd.f32 %v1096_v41, %v997_v11 }
 0x1cd   : > { %v1289_v22 = vadd.f32 %v2085_v57, %v1253_v39 }
 0x1ce   : > { %v1245_v10 = vadd.f32 %v1198_v36, %v1097_v24 }
 0x1cf   : > { %v1321_v42 = vmax.f32 %v1289_v22, 0.0  ;;  %v1200_v46 = vpop.f32.mrf.mxu2 }
 0x1d0   : > { %v1281_v45 = vadd.f32 %v2085_v57, %v1245_v10 }
 0x1d1   : > { %1353 = vst [vmem:[%s2096_s24 + $0xf0] sm:$0xff] %v1321_v42  ;;  %v999_v13 = vpop.f32.mrf.mxu0 }
 0x1d2   : > { %v1313_v51 = vmax.f32 %v1281_v45, 0.0  ;;  %v1220_v3 = vpop.f32.mrf.mxu3 }
 0x1d3   : > { %v1254_v38 = vadd.f32 %v1220_v3, %v1119_v48  ;;  %v1098_v37 = vpop.f32.mrf.mxu1 }
 0x1d4   : > { %1345 = vst [vmem:[%s2096_s24 + $0xb0] sm:$0xff] %v1313_v51  ;;  %v1099_v30 = vadd.f32 %v1098_v37, %v999_v13 }
 0x1d5   : > { %v1290_v47 = vadd.f32 %v2085_v57, %v1254_v38 }
 0x1d6   : > { %v1246_v58 = vadd.f32 %v1200_v46, %v1099_v30 }
 0x1d7   : > { %v1322_v28 = vmax.f32 %v1290_v47, 0.0 }
 0x1d8   : > { %v1282_v19 = vadd.f32 %v2085_v57, %v1246_v58 }
 0x1d9   : > { %1354 = vst [vmem:[%s2096_s24 + $0xf8] sm:$0xff] %v1322_v28 }
 0x1da   : > { %v1314_v0 = vmax.f32 %v1282_v19, 0.0 }
 0x1dc   : > { %1346 = vst [vmem:[%s2096_s24 + $0xb8] sm:$0xff] %v1314_v0 }
 0x1dd PF: > { %s14_s17 = sadd.s32 1, %s1686_s17   ;;  %s2247_s15 = smov %s1682_s16 }
 0x1de   : > { %p11_p5 = scmp.ge.s32.totalorder %s14_s17, 4   ;;  %s2248_s16 = smov %s2250_s18 }
 0x1e0   :  { %13 = sbr.rel (!%p11_p5) target bundleno = 2 (0x2), region = 71 }

</bundles_post_ra>
